<compile_context>
chip_gen: v7x
topology: tpu7x:2x2x1
jax: 0.10.0
libtpu: 0.0.40
codegen_flags: <defaults>
</compile_context>

<pallas_src>
import jax
import jax.numpy as jnp
from jax import lax
from jax.experimental import pallas as pl
from jax.experimental.pallas import tpu as pltpu

NUM_INPUTS = 4   # gym CartPole-v1 observation_space.shape[0]
HIDDEN = 16
OUT = 1


def net_kernel(x_ref, w1_ref, w2_ref, o_ref):
    # x_ref : (B, NUM_INPUTS)     natural module layout (no wrapper transpose)
    # w1_ref: (HIDDEN, NUM_INPUTS) torch layout (out, in)
    # w2_ref: (HIDDEN, OUT)        fc2 weight stored in kernel layout (16, 1)
    # o_ref : (OUT, B)             lane-dense output
    x = x_ref[...]
    w1 = w1_ref[...]
    w2 = w2_ref[...]

    # fc1 on the MXU: contract the shared `in` dim (dim 1 of both operands),
    # producing h^T = (16, B) directly — batch stays on the lane axis without
    # any wrapper-side x.T.  tanh runs on the EUP.
    h = jnp.tanh(
        lax.dot_general(
            w1, x,
            dimension_numbers=(((1,), (1,)), ((), ())),
            preferred_element_type=jnp.float32,
        )
    )

    # fc2 off the MXU: broadcast-mul by w2 (VPU slot) + reduce over the 16
    # hidden channels on the sublane axis (XLU slot).  Result (1, B) is
    # lane-dense, so the store is an unmasked vst for B >= 128.
    y = jnp.sum(h * w2, axis=0, keepdims=True)
    o_ref[...] = y.astype(o_ref.dtype)


@jax.jit
def net_forward(x, w1, w2):
    """Forward pass of Net.

    x : (B, NUM_INPUTS)
    w1: (HIDDEN, NUM_INPUTS)  -- fc1.weight in torch (out, in) layout
    w2: (HIDDEN, OUT)         -- fc2.weight pre-transposed to kernel layout
    returns (B, OUT), matching Net.forward.
    """
    B = x.shape[0]
    y_t = pl.pallas_call(
        net_kernel,
        out_shape=jax.ShapeDtypeStruct((OUT, B), x.dtype),
        in_specs=[
            pl.BlockSpec(memory_space=pltpu.MemorySpace.VMEM),  # x, whole array
            pl.BlockSpec(memory_space=pltpu.MemorySpace.VMEM),  # w1
            pl.BlockSpec(memory_space=pltpu.MemorySpace.VMEM),  # w2 (16, 1)
        ],
        out_specs=pl.BlockSpec(memory_space=pltpu.MemorySpace.VMEM),
    )(x, w1, w2)
    # (1, B) -> (B, 1) is a free row-major reshape (same data order), NOT a
    # transpose op.
    return y_t.reshape(B, OUT)


def init_params(key):
    """Deterministic init mimicking torch.nn.Linear default U(-1/sqrt(in), 1/sqrt(in)).

    fc1 weight is kept in torch layout (out=16, in=4); fc2 weight is stored
    directly in kernel layout (16, 1) == fc2.weight.T so the forward path
    never transposes it.
    """
    k1, k2 = jax.random.split(key)
    bound1 = 1.0 / jnp.sqrt(jnp.float32(NUM_INPUTS))
    bound2 = 1.0 / jnp.sqrt(jnp.float32(HIDDEN))
    w1 = jax.random.uniform(k1, (HIDDEN, NUM_INPUTS), jnp.float32,
                            minval=-bound1, maxval=bound1)
    w2 = jax.random.uniform(k2, (HIDDEN, OUT), jnp.float32,
                            minval=-bound2, maxval=bound2)
    return w1, w2


def net_ref(x, w1, w2):
    """Pure-JAX reference: fc2(tanh(fc1(x))).  w2 is in kernel (16, 1) layout."""
    return jnp.tanh(x @ w1.T) @ w2


if __name__ == "__main__":
    key = jax.random.PRNGKey(0)
    kx, kp = jax.random.split(key)
    B = 8   # callers controlling batching should prefer multiples of 128
    x = jax.random.normal(kx, (B, NUM_INPUTS), jnp.float32)
    w1, w2 = init_params(kp)

    out = jax.block_until_ready(net_forward(x, w1, w2))
    ref = net_ref(x, w1, w2)

    assert out.shape == (B, OUT), out.shape
    assert jnp.allclose(out, ref, atol=1e-5, rtol=1e-5), (out, ref)
    print("KERNEL_OK")
</pallas_src>

<mosaic_0001>
module attributes {stable_mosaic.version = 11 : i64} {
  func.func @net_kernel(%arg0: memref<8x4xf32, #tpu.memory_space<vmem>>, %arg1: memref<16x4xf32, #tpu.memory_space<vmem>>, %arg2: memref<16x1xf32, #tpu.memory_space<vmem>>, %arg3: memref<1x8xf32, #tpu.memory_space<vmem>>) attributes {dimension_semantics = [], scalar_prefetch = 0 : i64, scratch_operands = 0 : i64, tpu.core_type = #tpu.core_type<tc>} {
    %c0 = arith.constant 0 : index
    %c0_0 = arith.constant 0 : index
    %0 = vector.load %arg0[%c0, %c0_0] : memref<8x4xf32, #tpu.memory_space<vmem>>, vector<8x4xf32>
    %c0_1 = arith.constant 0 : index
    %c0_2 = arith.constant 0 : index
    %1 = vector.load %arg1[%c0_1, %c0_2] : memref<16x4xf32, #tpu.memory_space<vmem>>, vector<16x4xf32>
    %c0_3 = arith.constant 0 : index
    %c0_4 = arith.constant 0 : index
    %2 = vector.load %arg2[%c0_3, %c0_4] : memref<16x1xf32, #tpu.memory_space<vmem>>, vector<16x1xf32>
    %cst = arith.constant dense<0.000000e+00> : vector<16x8xf32>
    %3 = tpu.matmul %1, %0, %cst {dimension_numbers = #tpu.dot_dimension_numbers<[1], [1], [0], [0], [0, 0, 1, 0], [], []>} : vector<16x4xf32>, vector<8x4xf32>, vector<16x8xf32> -> vector<16x8xf32>
    %4 = math.tanh %3 : vector<16x8xf32>
    %5 = vector.broadcast %2 : vector<16x1xf32> to vector<16x8xf32>
    %6 = arith.mulf %4, %5 : vector<16x8xf32>
    %cst_5 = arith.constant dense<0.000000e+00> : vector<8xf32>
    %7 = vector.multi_reduction <add>, %6, %cst_5 [0] : vector<16x8xf32> to vector<8xf32>
    %8 = vector.shape_cast %7 : vector<8xf32> to vector<1x8xf32>
    %c0_6 = arith.constant 0 : index
    %c0_7 = arith.constant 0 : index
    %9 = vector.load %arg3[%c0_6, %c0_7] : memref<1x8xf32, #tpu.memory_space<vmem>>, vector<1x8xf32>
    tpu.vector_store %arg3[%c0_6, %c0_7], %8 {strides = array<i32>} : memref<1x8xf32, #tpu.memory_space<vmem>>, vector<1x8xf32>,
    return
  }
}

</mosaic_0001>

<bundles_post_ra>
// kernel: net_forward.1
= control target key start
LH: loop header
LB: loop body
LE: loop exit
PB: predicated region body
PF: predicated region fallthrough
CT: control target
= control target key end

     0   :  { %vm20_vm0 = vcmask 31744   ;;  %s236_s0 = inlined_call_operand.vmem [shape: f32[8,4], index: 0, kind: input, shape index: {}]   ;;  %s237_s1 = inlined_call_operand.vmem [shape: f32[16,4], index: 1, kind: input, shape index: {}]   ;;  %s238_s2 = inlined_call_operand.vmem [shape: f32[16,1], index: 2, kind: input, shape index: {}]   ;;  %s239_s3 = inlined_call_operand.hbm [shape: f32[1,8], index: 3, kind: output, shape index: {}]  }
   0x1   :  { %v15_v0 = vld [vmem:[%s236_s0] sm:$0xff] }
   0x2   :  { %v16_v1 = vld [vmem:[%s237_s1] sm:$0xff]  ;;  %151 = vmatprep.subr.msk.mxu0 %vm20_vm0, %v15_v0 }
   0x3   :  { %153 = vmatprep.mubr.msk.f32.mxu0 %vm20_vm0, %v16_v1  ;;  %v18_v2 = vld [vmem:[%s238_s2] sm:$0xff] }
   0x4   :  { %8 = vsyncpa [#allocation3], 0  ;;  %152 = vmatpush3.xpose.msk.msra.mxu0 %vm20_vm0, %v15_v0  ;;  %v17_v3 = vld [vmem:[%s237_s1 + $0x8] sm:$0xff]  ;;  %v187_v4 = vmov 0   ;;  %vm119_vm1 = vcmask 64512   ;;  %s188_s1 = smov [#allocation2]  }
   0x5   :  { %158 = vset.pattern.permute.xlu0 %v187_v4  ;;  %v19_v5 = vld [vmem:[%s238_s2 + $0x8] sm:$0xff]  ;;  %s137_s2 = sshll.u32 %s188_s1, 4  ;;  %vm129_vm2 = vcmask 57344   ;;  %s138_s2 = int_to_ptr.vmem [resolvable:$true] %s137_s2 }
   0x6   :  { %109 = vperm.xlu0 %158, %v18_v2   ;;  %s163_s21 = scalar_lea.vmem %s138_s2, 16  ;;  %s167_s22 = scalar_lea.vmem %s138_s2, 32 }
   0x7   :  { %154 = vmatmul.mubr.msk.f32.vlgmr.msra.gmra.mrb[0].mxu0 %vm20_vm0, %v17_v3  ;;  %p164_p0 = scmp.ne.s32.totalorder %s138_s2, %s163_s21  ;;  %p168_p1 = scmp.lt.s32.totalorder %s138_s2, %s138_s2 }
   0x8   :  { %p169_p2 = scmp.lt.s32.totalorder %s167_s22, %s163_s21 }
   0xa   :  { %114 = vperm.xlu0 %158, %v19_v5   ;;  %p170_p3 = por %p169_p2, %p168_p1 }
   0xc   :  { %p171_p4 = pnand %p170_p3, %p164_p0 }
  0x85   :  { %v110_v8 = vpop.permute.xlu0 %109 }
  0x89   :  { %v115_v10 = vpop.permute.xlu0 %114 }
  0xda   :  { %v155_v6 = vpop.f32.mrb[0].mxu0 }
  0xdb   :  { %159 = vtanh.f32 %v155_v6  ;;  %v96_v7 = vpop.f32.mrb[1].mxu0 }
  0xdc   :  { %161 = vtanh.f32 %v96_v7 }
  0xe5   :  { %v160_v9 = vpop.eup %159 }
  0xe6   :  { %v162_v11 = vpop.eup %161  ;;  %v118_v12 = vmul.f32 %v160_v9, %v115_v10 }
  0xe7   :  { %v117_v13 = vmul.f32 %v162_v11, %v110_v8 }
  0xe8   :  { %v121_v14 = vsel %vm119_vm1, %v118_v12, 0.0 }
  0xe9   :  { %v120_v15 = vsel %vm119_vm1, %v117_v13, 0.0 }
  0xea   :  { %v122_v16 = vadd.f32 %v121_v14, %v120_v15 }
  0xec   :  { %v123_v17 = vrot.slane %v122_v16, 4 }
  0xee   :  { %v124_v18 = vadd.f32 %v123_v17, %v122_v16 }
  0xf0   :  { %v125_v19 = vrot.slane %v124_v18, 2 }
  0xf2   :  { %v126_v20 = vadd.f32 %v125_v19, %v124_v18 }
  0xf4   :  { %v127_v21 = vrot.slane %v126_v20, 1 }
  0xf6   :  { %v128_v22 = vadd.f32 %v127_v21, %v126_v20 }
  0xf8   :  { %130 = vst.msk [vmem:[#allocation2] sm:$0x1] %vm129_vm2, %v128_v22 }
  0xf9   :  { %174 = shalt.err (!%p171_p4)
}
  0xfa   :  { %s175_s25 = scalar_lea.hbm %s239_s3, 16 }
  0xfb   :  { %p176_p5 = scmp.ne.s32.totalorder %s239_s3, %s175_s25  ;;  %p179_p6 = scmp.lt.u32.totalorder %s175_s25, %s239_s3 }
  0xfd   :  { %p181_p7 = pnand %p179_p6, %p176_p5 }
  0xff   :  { %184 = shalt.err (!%p181_p7)
}
 0x100   :  { %140 = dma.vmem_to_hbm [thread:$0]  %s138_s2, 16, %s239_s3, [#allocation3]  }
 0x101   :  { %185 = dma.done.wait [#allocation3], 16  }
 0x102   :  { %186 = vsyncadd [#allocation3], 4294967280 }
 0x103   :  { %144 = vsyncpa [#allocation3], 1 }

</bundles_post_ra>
